<compile_context>
chip_gen: v7x
topology: tpu7x:2x2x1
jax: 0.10.0
libtpu: 0.0.40
codegen_flags: <defaults>
</compile_context>

<pallas_src>
import functools

import jax
import jax.numpy as jnp
from jax.experimental import pallas as pl
from jax.experimental.pallas import tpu as pltpu


def _round_up(a, b):
    return (a + b - 1) // b * b


def _sublane_multiple(dtype):
    size = jnp.dtype(dtype).itemsize
    if size >= 4:
        return 8
    if size == 2:
        return 16
    return 32


def _pick_seq_tile(L, B, dtype, max_tile=1024):
    """Sequence tile: multiple of the sublane count, <= max_tile."""
    sub = _sublane_multiple(dtype)
    tile = min(max_tile, _round_up(L, sub))
    tile = _round_up(tile, sub)
    # v7x has 2 TensorCores: when B == 1, prefer an even number of seq tiles
    # so the "parallel" grid splits evenly across both cores.
    if B == 1:
        n = -(-L // tile)
        if n > 1 and n % 2 == 1:
            cand = _round_up(-(-L // (n + 1)), sub)
            if cand > 0 and (-(-L // cand)) % 2 == 0:
                tile = cand
    return tile


def _layernorm_f32(x, eps):
    # LayerNorm(hidden, elementwise_affine=False): biased variance, last dim.
    mu = jnp.mean(x, axis=-1, keepdims=True)
    xc = x - mu
    var = jnp.mean(xc * xc, axis=-1, keepdims=True)
    return xc * jax.lax.rsqrt(var + eps)


def _final_layer_cond_kernel(x_ref, shift_ref, scale1_ref, w_ref, b_ref,
                             out_ref, *, eps):
    # x_ref:      (1, tL, H)  current (batch, seq-tile) block
    # shift_ref:  (1, 1, H)   precomputed shift for this batch element (f32)
    # scale1_ref: (1, 1, H)   precomputed (1 + scale)                  (f32)
    # w_ref:      (H, Pp)     linear weight, zero-padded to lane-dense Pp
    # b_ref:      (1, Pp)
    # out_ref:    (1, tL, Pp)
    x = x_ref[0].astype(jnp.float32)                       # (tL, H)
    xn = _layernorm_f32(x, eps)
    xm = xn * scale1_ref[0].astype(jnp.float32) + shift_ref[0].astype(jnp.float32)
    # MXU matmul in the weight's native dtype, f32 accumulation.
    out = jnp.dot(xm.astype(w_ref.dtype), w_ref[...],
                  preferred_element_type=jnp.float32)
    out = out + b_ref[...].astype(jnp.float32)             # (tL, Pp)
    out_ref[0] = out.astype(out_ref.dtype)


def _final_layer_uncond_kernel(x_ref, w_ref, b_ref, out_ref, *, eps):
    # Unconditional path: Linear(LayerNorm(x))
    x = x_ref[0].astype(jnp.float32)                       # (tL, H)
    xn = _layernorm_f32(x, eps)
    out = jnp.dot(xn.astype(w_ref.dtype), w_ref[...],
                  preferred_element_type=jnp.float32)
    out = out + b_ref[...].astype(jnp.float32)
    out_ref[0] = out.astype(out_ref.dtype)


def final_layer_pallas(x, params, c=None, *, eps=1e-6, seq_tile=None):
    """x: (B, L, H); c: optional (B, H).  Returns (B, L, P).

    params: dict with
      'w_lin' (H, P), 'b_lin' (P,)     -- self.linear (weight stored (in, out))
      'w_ada' (H, 2H), 'b_ada' (2H,)   -- adaLN Linear (only used if c given)
    """
    B, L, H = x.shape
    w_lin = params["w_lin"]
    b_lin = params["b_lin"]
    P = w_lin.shape[1]
    wdt = w_lin.dtype

    # Lane-dense / MXU-friendly output width: zero-pad P up to a 128 multiple.
    P_pad = max(128, _round_up(P, 128))
    if P_pad != P:
        w_lin = jnp.pad(w_lin, ((0, 0), (0, P_pad - P)))
        b_lin = jnp.pad(b_lin, ((0, P_pad - P),))
    b_lin = b_lin.reshape(1, P_pad)

    # Sequence tiling: always a sublane multiple; pad L if it doesn't divide.
    sub = _sublane_multiple(x.dtype)
    if seq_tile is None:
        seq_tile = _pick_seq_tile(L, B, x.dtype)
    seq_tile = max(sub, _round_up(seq_tile, sub))
    L_pad = _round_up(L, seq_tile)
    if L_pad != L:
        # LayerNorm of an all-zero row is finite (xc = 0), padded rows are
        # sliced away below.
        x = jnp.pad(x, ((0, 0), (0, L_pad - L), (0, 0)))
    nL = L_pad // seq_tile
    grid = (B, nL)

    # Explicit VMEM budget: x/out blocks double-buffered, weights Buffered(1).
    x_item = jnp.dtype(x.dtype).itemsize
    w_item = jnp.dtype(wdt).itemsize
    vmem_bytes = (2 * seq_tile * H * x_item          # x blocks
                  + 2 * seq_tile * P_pad * x_item    # out blocks
                  + (H + 1) * P_pad * w_item         # w_lin + b_lin (single)
                  + 4 * H * 4)                       # shift / (1+scale)
    vmem_bytes = int(vmem_bytes * 1.5) + (1 << 20)
    cparams = pltpu.CompilerParams(
        dimension_semantics=("parallel", "parallel"),
        vmem_limit_bytes=min(max(vmem_bytes, 32 << 20), 100 << 20),
    )

    out_shape = jax.ShapeDtypeStruct((B, L_pad, P_pad), x.dtype)
    x_spec = pl.BlockSpec((1, seq_tile, H), lambda b, l: (b, l, 0))
    out_spec = pl.BlockSpec((1, seq_tile, P_pad), lambda b, l: (b, l, 0))
    # Constant-index weights: single-buffered to halve their VMEM footprint.
    w_spec = pl.BlockSpec((H, P_pad), lambda b, l: (0, 0),
                          pipeline_mode=pl.Buffered(1))
    bias_spec = pl.BlockSpec((1, P_pad), lambda b, l: (0, 0),
                             pipeline_mode=pl.Buffered(1))

    if c is None:
        kernel = functools.partial(_final_layer_uncond_kernel, eps=eps)
        out = pl.pallas_call(
            kernel,
            out_shape=out_shape,
            grid_spec=pltpu.PrefetchScalarGridSpec(
                num_scalar_prefetch=0,
                grid=grid,
                in_specs=[x_spec, w_spec, bias_spec],
                out_specs=out_spec,
            ),
            compiler_params=cparams,
        )(x, w_lin, b_lin)
    else:
        # adaLN projection hoisted to the wrapper (M=1 matmul, done once per
        # batch element with plain XLA instead of nL times on the MXU).
        w_ada = params["w_ada"]
        b_ada = params["b_ada"]
        ada = (jax.nn.silu(c.astype(jnp.float32))
               @ w_ada.astype(jnp.float32)
               + b_ada.astype(jnp.float32))                 # (B, 2H)
        shift = ada[:, :H].reshape(B, 1, H)
        scale1 = (1.0 + ada[:, H:]).reshape(B, 1, H)
        cvec_spec = pl.BlockSpec((1, 1, H), lambda b, l: (b, 0, 0))

        kernel = functools.partial(_final_layer_cond_kernel, eps=eps)
        out = pl.pallas_call(
            kernel,
            out_shape=out_shape,
            grid_spec=pltpu.PrefetchScalarGridSpec(
                num_scalar_prefetch=0,
                grid=grid,
                in_specs=[x_spec, cvec_spec, cvec_spec, w_spec, bias_spec],
                out_specs=out_spec,
            ),
            compiler_params=cparams,
        )(x, shift, scale1, w_lin, b_lin)

    return out[:, :L, :P]


def final_layer_ref(x, params, c=None, eps=1e-6):
    """Pure-JAX reference mirroring the PyTorch module (eval mode)."""
    xf = x.astype(jnp.float32)
    mu = jnp.mean(xf, axis=-1, keepdims=True)
    var = jnp.mean((xf - mu) ** 2, axis=-1, keepdims=True)
    xn = (xf - mu) * jax.lax.rsqrt(var + eps)
    if c is not None:
        ada = (jax.nn.silu(c.astype(jnp.float32))
               @ params["w_ada"].astype(jnp.float32)
               + params["b_ada"].astype(jnp.float32))
        H = x.shape[-1]
        shift, scale = ada[:, :H], ada[:, H:]
        xn = xn * (1.0 + scale[:, None, :]) + shift[:, None, :]
    out = xn @ params["w_lin"].astype(jnp.float32) + params["b_lin"].astype(jnp.float32)
    return out.astype(x.dtype)


if __name__ == "__main__":
    # Small shapes consistent with the module.
    B, L = 2, 8
    hidden = 32
    patch_size = 2
    out_channels = 4
    P = patch_size * patch_size * out_channels   # 16

    key = jax.random.PRNGKey(0)
    kx, kc, k1, k2, k3, k4 = jax.random.split(key, 6)

    x = jax.random.normal(kx, (B, L, hidden), dtype=jnp.float32)
    c = jax.random.normal(kc, (B, hidden), dtype=jnp.float32)

    # Deterministic parameter init (weights stored as (in, out)).
    params = {
        "w_lin": jax.random.normal(k1, (hidden, P), dtype=jnp.float32) * 0.05,
        "b_lin": jax.random.normal(k2, (P,), dtype=jnp.float32) * 0.05,
        "w_ada": jax.random.normal(k3, (hidden, 2 * hidden), dtype=jnp.float32) * 0.05,
        "b_ada": jax.random.normal(k4, (2 * hidden,), dtype=jnp.float32) * 0.05,
    }

    # Conditional (adaLN-modulated) path.
    out_cond = jax.block_until_ready(final_layer_pallas(x, params, c))
    # Unconditional path (c=None).
    out_unc = jax.block_until_ready(final_layer_pallas(x, params, None))

    ref_cond = final_layer_ref(x, params, c)
    ref_unc = final_layer_ref(x, params, None)

    assert out_cond.shape == (B, L, P)
    assert out_unc.shape == (B, L, P)
    assert jnp.allclose(out_cond, ref_cond, atol=1e-4, rtol=1e-4), "cond path mismatch"
    assert jnp.allclose(out_unc, ref_unc, atol=1e-4, rtol=1e-4), "uncond path mismatch"

    print("KERNEL_OK")
</pallas_src>

<mosaic_0001>
module attributes {stable_mosaic.version = 11 : i64} {
  func.func @_final_layer_cond_kernel(%arg0: i32, %arg1: i32, %arg2: memref<1x8x32xf32, #tpu.memory_space<vmem>>, %arg3: memref<1x1x32xf32, #tpu.memory_space<vmem>>, %arg4: memref<1x1x32xf32, #tpu.memory_space<vmem>>, %arg5: memref<32x128xf32, #tpu.memory_space<vmem>>, %arg6: memref<1x128xf32, #tpu.memory_space<vmem>>, %arg7: memref<1x8x128xf32, #tpu.memory_space<vmem>>) attributes {dimension_semantics = [#tpu.dimension_semantics<parallel>, #tpu.dimension_semantics<parallel>], iteration_bounds = array<i64: 2, 1>, scalar_prefetch = 0 : i64, scratch_operands = 0 : i64, tpu.core_type = #tpu.core_type<tc>, window_params = [{transform_indices = @transform_0, window_bounds = array<i64: 1, 8, 32>}, {transform_indices = @transform_1, window_bounds = array<i64: 1, 1, 32>}, {transform_indices = @transform_2, window_bounds = array<i64: 1, 1, 32>}, {pipeline_mode = #tpu.pipeline_mode<synchronous>, transform_indices = @transform_3, window_bounds = array<i64: 32, 128>}, {pipeline_mode = #tpu.pipeline_mode<synchronous>, transform_indices = @transform_4, window_bounds = array<i64: 1, 128>}, {transform_indices = @transform_5, window_bounds = array<i64: 1, 8, 128>}]} {
    %c0 = arith.constant 0 : index
    %c0_0 = arith.constant 0 : index
    %c0_1 = arith.constant 0 : index
    %0 = vector.load %arg2[%c0, %c0_0, %c0_1] : memref<1x8x32xf32, #tpu.memory_space<vmem>>, vector<1x8x32xf32>
    %1 = vector.shape_cast %0 : vector<1x8x32xf32> to vector<8x32xf32>
    %cst = arith.constant dense<0.000000e+00> : vector<8xf32>
    %2 = vector.multi_reduction <add>, %1, %cst [1] : vector<8x32xf32> to vector<8xf32>
    %3 = vector.shape_cast %2 : vector<8xf32> to vector<8x1xf32>
    %cst_2 = arith.constant 3.200000e+01 : f32
    %4 = vector.broadcast %cst_2 : f32 to vector<8x1xf32>
    %5 = arith.divf %3, %4 : vector<8x1xf32>
    %6 = vector.broadcast %5 : vector<8x1xf32> to vector<8x32xf32>
    %7 = arith.subf %1, %6 : vector<8x32xf32>
    %8 = arith.mulf %7, %7 : vector<8x32xf32>
    %cst_3 = arith.constant dense<0.000000e+00> : vector<8xf32>
    %9 = vector.multi_reduction <add>, %8, %cst_3 [1] : vector<8x32xf32> to vector<8xf32>
    %10 = vector.shape_cast %9 : vector<8xf32> to vector<8x1xf32>
    %cst_4 = arith.constant 3.200000e+01 : f32
    %11 = vector.broadcast %cst_4 : f32 to vector<8x1xf32>
    %12 = arith.divf %10, %11 : vector<8x1xf32>
    %cst_5 = arith.constant 9.99999997E-7 : f32
    %13 = vector.broadcast %cst_5 : f32 to vector<8x1xf32>
    %14 = arith.addf %12, %13 : vector<8x1xf32>
    %15 = math.rsqrt %14 : vector<8x1xf32>
    %16 = vector.broadcast %15 : vector<8x1xf32> to vector<8x32xf32>
    %17 = arith.mulf %7, %16 : vector<8x32xf32>
    %c0_6 = arith.constant 0 : index
    %c0_7 = arith.constant 0 : index
    %c0_8 = arith.constant 0 : index
    %18 = vector.load %arg4[%c0_6, %c0_7, %c0_8] : memref<1x1x32xf32, #tpu.memory_space<vmem>>, vector<1x1x32xf32>
    %19 = vector.shape_cast %18 : vector<1x1x32xf32> to vector<1x32xf32>
    %20 = vector.broadcast %19 : vector<1x32xf32> to vector<8x32xf32>
    %21 = arith.mulf %17, %20 : vector<8x32xf32>
    %c0_9 = arith.constant 0 : index
    %c0_10 = arith.constant 0 : index
    %c0_11 = arith.constant 0 : index
    %22 = vector.load %arg3[%c0_9, %c0_10, %c0_11] : memref<1x1x32xf32, #tpu.memory_space<vmem>>, vector<1x1x32xf32>
    %23 = vector.shape_cast %22 : vector<1x1x32xf32> to vector<1x32xf32>
    %24 = vector.broadcast %23 : vector<1x32xf32> to vector<8x32xf32>
    %25 = arith.addf %21, %24 : vector<8x32xf32>
    %c0_12 = arith.constant 0 : index
    %c0_13 = arith.constant 0 : index
    %26 = vector.load %arg5[%c0_12, %c0_13] : memref<32x128xf32, #tpu.memory_space<vmem>>, vector<32x128xf32>
    %cst_14 = arith.constant dense<0.000000e+00> : vector<8x128xf32>
    %27 = tpu.matmul %25, %26, %cst_14 {dimension_numbers = #tpu.dot_dimension_numbers<[1], [0], [0], [1], [0, 0, 1, 1], [], []>} : vector<8x32xf32>, vector<32x128xf32>, vector<8x128xf32> -> vector<8x128xf32>
    %c0_15 = arith.constant 0 : index
    %c0_16 = arith.constant 0 : index
    %28 = vector.load %arg6[%c0_15, %c0_16] : memref<1x128xf32, #tpu.memory_space<vmem>>, vector<1x128xf32>
    %29 = vector.broadcast %28 : vector<1x128xf32> to vector<8x128xf32>
    %30 = arith.addf %27, %29 : vector<8x128xf32>
    %c0_17 = arith.constant 0 : index
    %c0_18 = arith.constant 0 : index
    %c0_19 = arith.constant 0 : index
    %31 = vector.load %arg7[%c0_17, %c0_18, %c0_19] : memref<1x8x128xf32, #tpu.memory_space<vmem>>, vector<1x8x128xf32>
    %32 = vector.shape_cast %31 : vector<1x8x128xf32> to vector<8x128xf32>
    %33 = vector.shape_cast %30 : vector<8x128xf32> to vector<1x8x128xf32>
    tpu.vector_store %arg7[%c0_17, %c0_18, %c0_19], %33 {strides = array<i32>} : memref<1x8x128xf32, #tpu.memory_space<vmem>>, vector<1x8x128xf32>,
    return
  }
  func.func @transform_0(%arg0: i32, %arg1: i32) -> (i32, i32, i32) {
    %c0_i32 = arith.constant 0 : i32
    %c0_i32_0 = arith.constant 0 : i32
    return %arg0, %arg1, %c0_i32 : i32, i32, i32
  }
  func.func @transform_1(%arg0: i32, %arg1: i32) -> (i32, i32, i32) {
    %c0_i32 = arith.constant 0 : i32
    %c0_i32_0 = arith.constant 0 : i32
    %c0_i32_1 = arith.constant 0 : i32
    return %arg0, %c0_i32, %c0_i32_0 : i32, i32, i32
  }
  func.func @transform_2(%arg0: i32, %arg1: i32) -> (i32, i32, i32) {
    %c0_i32 = arith.constant 0 : i32
    %c0_i32_0 = arith.constant 0 : i32
    %c0_i32_1 = arith.constant 0 : i32
    return %arg0, %c0_i32, %c0_i32_0 : i32, i32, i32
  }
  func.func @transform_3(%arg0: i32, %arg1: i32) -> (i32, i32) {
    %c0_i32 = arith.constant 0 : i32
    %c0_i32_0 = arith.constant 0 : i32
    %c0_i32_1 = arith.constant 0 : i32
    return %c0_i32, %c0_i32_0 : i32, i32
  }
  func.func @transform_4(%arg0: i32, %arg1: i32) -> (i32, i32) {
    %c0_i32 = arith.constant 0 : i32
    %c0_i32_0 = arith.constant 0 : i32
    %c0_i32_1 = arith.constant 0 : i32
    return %c0_i32, %c0_i32_0 : i32, i32
  }
  func.func @transform_5(%arg0: i32, %arg1: i32) -> (i32, i32, i32) {
    %c0_i32 = arith.constant 0 : i32
    %c0_i32_0 = arith.constant 0 : i32
    return %arg0, %arg1, %c0_i32 : i32, i32, i32
  }
}

</mosaic_0001>

<bundles_post_ra>
// kernel: tpu_custom_call.1
= control target key start
LH: loop header
LB: loop body
LE: loop exit
PB: predicated region body
PF: predicated region fallthrough
CT: control target
= control target key end

     0   :  { %10 = vsyncpa [#allocation3], 0  ;;  %s1077_s0 = inlined_call_operand.hbm [shape: f32[2,8,32], index: 0, kind: input, shape index: {}]   ;;  %s1078_s1 = inlined_call_operand.vmem [shape: f32[2,1,32], index: 1, kind: input, shape index: {}]   ;;  %s1079_s2 = inlined_call_operand.vmem [shape: f32[2,1,32], index: 2, kind: input, shape index: {}]   ;;  %s1080_s3 = inlined_call_operand.hbm [shape: f32[32,128], index: 3, kind: input, shape index: {}]   ;;  %s1081_s4 = inlined_call_operand.vmem [shape: f32[1,128], index: 4, kind: input, shape index: {}]   ;;  %s1082_s5 = inlined_call_operand.hbm [shape: f32[2,8,128], index: 5, kind: output, shape index: {}]  }
   0x1   :  { %12 = vsyncpa [#allocation3 + $0x1], 0 }
   0x2   :  { %13 = vsyncpa [#allocation6], 0 }
   0x3   :  { %14 = vsyncpa [#allocation4], 0 }
   0x4   :  { %16 = vsyncpa [#allocation4 + $0x1], 0  ;;  %s845_s18 = smov 0   ;;  %s847_s19 = smov 0  }
   0x5   :  { %s849_s20 = smov 0   ;;  %s851_s21 = smov 0  }
   0x6   :  { %s853_s22 = smov 0   ;;  %s855_s23 = smov 0  }
   0x7 LB: > { %s540_s24 = sadd.s32 4294967295, %s805_s23   ;;  %s541_s25 = sadd.s32 4294967294, %s805_s23   ;;  %s805_s23 = sphi %s855_s23, %s22_s23   ;;  %s801_s22 = sphi %s853_s22, %s1106_s22   ;;  %s797_s21 = sphi %s851_s21, %s1105_s21   ;;  %s793_s20 = sphi %s849_s20, %s1104_s20   ;;  %s789_s19 = sphi %s847_s19, %s1103_s19   ;;  %s785_s18 = sphi %s845_s18, %s1102_s18  }
   0x8   : > { %p56_p0 = scmp.ne.s32.totalorder %s789_s19, %s785_s18  ;;  %p879_p1 = scmp.eq.s32.totalorder %s540_s24, 0 }
   0x9   : > { %p883_p2 = scmp.eq.s32.totalorder %s540_s24, 1  ;;  %p182_p3 = scmp.eq.s32.totalorder %s541_s25, 1 }
   0xa   : > { %s1087_s26 = scalar_select %p879_p1, 1, 0 }
   0xb   : > { %s1088_s27 = scalar_select %p883_p2, 1, 0 }
   0xc   : > { %p889_p4 = por %p879_p1, %p56_p0  ;;  %p542_p5 = scmp.ge.s32.totalorder %s805_s23, 1 }
   0xd   : > { %p894_p6 = por %p182_p3, %p56_p0  ;;  %p189_p7 = scmp.lt.s32.totalorder %s805_s23, 3 }
   0xe   : > { %s1089_s28 = scalar_select %p889_p4, 1, 0 }
   0xf   : > { %s1090_s29 = scalar_select %p894_p6, 1, 0 }
  0x10   : > { %p899_p8 = pnand %p542_p5, %p189_p7  ;;  %s807_s6 = smov [#allocation5]  }
  0x11   : > { %s201_s7 = sshll.u32 %s807_s6, 4  ;;  %s34_s9 = sadd.s32 1, %s801_s22  ;;  %s202_s7 = int_to_ptr.vmem [resolvable:$true] %s201_s7 }
  0x12   : > { %s1091_s30 = scalar_select %p899_p8, 1, 0 }
  0x13   : > { %p589_p9 = pneg %p899_p8  ;;  %s661_s12 = scalar_lea.hbm %s1080_s3, 512 }
  0x14   : > { %p662_p12 = scmp.ne.s32.totalorder %s1080_s3, %s661_s12  ;;  %p668_p5 = scmp.lt.u32.totalorder %s661_s12, %s1080_s3 }
  0x15   : > { %p908_p11 = pnand %p589_p9, %p879_p1 }
  0x17   : > { %p663_p13 = pneg %p908_p11 }
  0x19   : > { %p664_p0 = pnand %p663_p13, %p662_p12 }
  0x1b   : > { %p665_p3 = pneg %p664_p0 }
  0x1d   : > { %p670_p7 = pnand %p668_p5, %p665_p3 }
  0x1f   : > { %673 = shalt.err (!%p670_p7)
}
  0x20   : > { %s674_s17 = scalar_lea.vmem %s202_s7, 512  ;;  %p682_p1 = scmp.lt.s32.totalorder %s202_s7, %s202_s7 }
  0x21   : > { %p675_p9 = scmp.ne.s32.totalorder %s202_s7, %s674_s17  ;;  %p683_p4 = scmp.lt.s32.totalorder %s674_s17, %s674_s17 }
  0x23   : > { %p677_p10 = pnand %p675_p9, %p663_p13  ;;  %p684_p8 = por %p683_p4, %p682_p1 }
  0x25   : > { %p678_p6 = pneg %p677_p10 }
  0x27   : > { %p685_p2 = pnand %p684_p8, %p678_p6 }
  0x29   : > { %688 = shalt.err (!%p685_p2)
}
  0x2a   : > { %s808_s24 = smov 128   ;;  %s809_s25 = smov 8  }
  0x2b   : > { %592 = dma.hbm_to_vmem [thread:$0]  (!%p908_p11), %s1080_s3, 512, %s202_s7, [#allocation6], %s808_s24, %s808_s24, %s809_s25  }
  0x2c   : > { %p36_p1 = scmp.ge.s32.totalorder %s34_s9, 2  ;;  %s43_s11 = sadd.s32 1, %s793_s20 }
  0x2d   : > { %p50_p2 = scmp.ne.s32.totalorder %s793_s20, %s789_s19  ;;  %p51_p4 = scmp.eq.s32.totalorder %s805_s23, 0 }
  0x2e   : > { %s1108_s9 = smov (%p36_p1, %s34_s9), 0  ;;  %p1094_p8 = scmp.ne.s32.totalorder %s1088_s27, 0 }
  0x2f   : > { %p935_p6 = por %p51_p4, %p50_p2  ;;  %s38_s8 = ssub.s32 %s801_s22, %s1108_s9 }
  0x30   : > { %p941_p10 = por %p1094_p8, %p50_p2  ;;  %p602_p12 = scmp.lt.s32.totalorder %s805_s23, 2 }
  0x31   : > { %p41_p11 = scmp.eq.s32.totalorder %s38_s8, 0  ;;  %s218_s7 = sand.u32 1, %s793_s20  }
  0x32   : > { %s545_s14 = sshll.u32 %s218_s7, 3  ;;  %s546_s16 = sshll.u32 %s801_s22, 7 }
  0x33   : > { %s950_s15 = scalar_select %p41_p11, %s793_s20, %s43_s11  }
  0x34   : > { %s956_s25 = scalar_lea.hbm %s1077_s0, %s546_s16  ;;  %s222_s27 = scalar_lea.vmem [#allocation2], %s545_s14 }
  0x35   : > { %s230_s6 = sshll.u32 %s222_s27, 4  ;;  %p962_p13 = pnand %p602_p12, %p935_p6  ;;  %s958_s6 = int_to_ptr.vmem [resolvable:$true] %s230_s6 }
  0x36   : > { %s219_s11 = scalar_lea.sflag [#allocation3], %s218_s7  ;;  %s689_s8 = scalar_lea.hbm %s956_s25, 128 }
  0x37   : > { %p690_p0 = scmp.ne.s32.totalorder %s956_s25, %s689_s8  ;;  %p691_p3 = pneg %p962_p13 }
  0x38   : > { %s694_s17 = scalar_lea.hbm %s1077_s0, 256  ;;  %p695_p9 = scmp.lt.u32.totalorder %s956_s25, %s1077_s0 }
  0x39   : > { %p692_p5 = pnand %p691_p3, %p690_p0  ;;  %p696_p1 = scmp.lt.u32.totalorder %s694_s17, %s689_s8 }
  0x3a   : > { %p698_p4 = scmp.lt.u32.totalorder %s689_s8, %s956_s25 }
  0x3b   : > { %p693_p7 = pneg %p692_p5  ;;  %p697_p2 = por %p696_p1, %p695_p9 }
  0x3d   : > { %p699_p6 = por %p698_p4, %p697_p2 }
  0x3f   : > { %p700_p8 = pnand %p699_p6, %p693_p7 }
  0x41   : > { %703 = shalt.err (!%p700_p8)
}
  0x42   : > { %s704_s7 = scalar_lea.vmem %s958_s6, 128  ;;  %s810_s27 = smov [#allocation2]  }
  0x43   : > { %p705_p12 = scmp.ne.s32.totalorder %s958_s6, %s704_s7  ;;  %s709_s14 = sshll.u32 %s810_s27, 4  ;;  %s710_s14 = int_to_ptr.vmem [resolvable:$false] %s709_s14 }
  0x44   : > { %s711_s16 = scalar_lea.vmem %s710_s14, 256  ;;  %p712_p5 = scmp.lt.s32.totalorder %s958_s6, %s710_s14 }
  0x45   : > { %p707_p11 = pnand %p705_p12, %p691_p3  ;;  %p713_p9 = scmp.lt.s32.totalorder %s711_s16, %s704_s7 }
  0x47   : > { %p708_p0 = pneg %p707_p11  ;;  %p714_p1 = por %p713_p9, %p712_p5 }
  0x49   : > { %p715_p2 = pnand %p714_p1, %p708_p0 }
  0x4b   : > { %718 = shalt.err (!%p715_p2)
}
  0x4c   : > { %596 = dma.hbm_to_vmem [thread:$0]  (!%p962_p13), %s956_s25, 128, %s958_s6, %s219_s11  }
  0x4d   : > { %p1097_p7 = scmp.ne.s32.totalorder %s1091_s30, 0 }
  0x4e   : > { %s994_s8 = sand.u32 (!%p1097_p7), 1, %s789_s19   ;;  %p1098_p3 = scmp.ne.s32.totalorder (!%p1097_p7), %s1089_s28, 0 }
  0x4f   : > { %251 = sbr.rel (%p1097_p7) target bundleno = 632 (0x278), region = 40  ;;  %s548_s17 = sshll.u32 (!%p1097_p7), %s994_s8, 3 }
  0x50   : > { %s254_s12 = scalar_lea.sflag (!%p1097_p7), [#allocation3], %s994_s8  ;;  %s257_s24 = scalar_lea.vmem (!%p1097_p7), [#allocation2], %s548_s17 }
  0x56   : > { %772 = dma.done.wait (%p1098_p3), %s254_s12, 128  }
  0x57   : > { %774 = vsyncadd (%p1098_p3), %s254_s12, 4294967168  ;;  %p1099_p13 = scmp.ne.s32.totalorder %s1087_s26, 0 }
  0x59   : > { %776 = dma.done.wait (%p1099_p13), [#allocation6], 512  }
  0x5a   : > { %778 = vsyncadd (%p1099_p13), [#allocation6], 4294966784  ;;  %vm301_vm0 = vcmask 261120   ;;  %v300_v0 = vld [vmem:[%s257_s24] sm:$0xff]  ;;  %v332_v7 = vld [vmem:[#allocation5] sm:$0xff]  ;;  %v811_v10 = vmov 0.0|0.0  }
  0x5b   : > { %v302_v1 = vsel %vm301_vm0, %v300_v0, 0.0  ;;  %v333_v8 = vld [vmem:[#allocation5 + $0x8] sm:$0xff]  ;;  %v334_v9 = vld [vmem:[#allocation5 + $0x10] sm:$0xff]  ;;  %575 = vmatprep.subr.bf16.mxu0 %v811_v10  ;;  %v335_v12 = vld [vmem:[#allocation5 + $0x18] sm:$0xff]  ;;  %vm812_vm1 = vmmov 0   ;;  %v813_v13 = vmov 0.0  }
  0x5c   : > { %303 = vadd.xlane.f32.xlu0 %v302_v1  ;;  %v576_v11 = vpack.c.bf16 %v333_v8, %v332_v7  ;;  %572 = vmatprep.mubr.msk.f32.mxu0 %vm812_vm1, %v813_v13  ;;  %v579_v14 = vpack.c.bf16 %v335_v12, %v334_v9  ;;  %p294_p4 = scmp.lt.s32.totalorder %s797_s21, 1  ;;  %v553_v24 = vld [vmem:[%s1081_s4] ss:$0 sm:$0xff]  ;;  %s556_s14 = sshll.u32 %s797_s21, 7 }
  0x5d   : > { %s293_s16 = scalar_lea.vmem [#allocation7], %s548_s17  ;;  %s1028_s28 = scalar_lea.hbm %s1082_s5, %s556_s14 }
  0x5e   : > { %577 = vmatpush3.bf16.msra.mxu0 %v576_v11  ;;  %s295_s26 = scalar_select %p294_p4, %s797_s21, 1 }
  0x5f   : > { %578 = vmatprep.subr.bf16.mxu0 %v811_v10  ;;  %s432_s12 = sshll.u32 %s293_s16, 4  ;;  %s418_s30 = scalar_lea.sflag [#allocation4], %s994_s8  ;;  %s1030_s12 = int_to_ptr.vmem [resolvable:$true] %s432_s12 }
  0x60   : > { %s299_s25 = scalar_lea.vmem %s1079_s2, %s295_s26  ;;  %s296_s11 = scalar_lea.vmem %s1078_s1, %s295_s26 }
  0x61   : > { %v551_v19 = vld [vmem:[%s299_s25] ss:$0 sm:$0xff]  ;;  %s719_s25 = scalar_lea.vmem %s1030_s12, 128  ;;  %s814_s21 = smov [#allocation7]  }
  0x62   : > { %580 = vmatpush3.bf16.msra.mxu0 %v579_v14  ;;  %v552_v21 = vld [vmem:[%s296_s11] ss:$0 sm:$0xff]  ;;  %p720_p6 = scmp.ne.s32.totalorder %s1030_s12, %s719_s25  ;;  %s723_s17 = sshll.u32 %s814_s21, 4  ;;  %s724_s17 = int_to_ptr.vmem [resolvable:$false] %s723_s17 }
  0x63   : > { %s725_s6 = scalar_lea.vmem %s724_s17, 256  ;;  %p726_p11 = scmp.lt.s32.totalorder %s1030_s12, %s724_s17 }
  0x64   : > { %p721_p8 = pnand %p720_p6, %p941_p10  ;;  %p727_p0 = scmp.lt.s32.totalorder %s725_s6, %s719_s25 }
  0x66   : > { %p722_p12 = pneg %p721_p8  ;;  %p728_p5 = por %p727_p0, %p726_p11 }
  0x68   : > { %p729_p9 = pnand %p728_p5, %p722_p12 }
  0xe9   : > { %v304_v2 = vpop.xlane.xlu0 %303 }
  0xea   : > { %v306_v3 = vmul.f32 0.03125, %v304_v2 }
  0xec   : > { %v307_v4 = vsub.f32 %v300_v0, %v306_v3 }
  0xee   : > { %v308_v5 = vmul.f32 %v307_v4, %v307_v4 }
  0xf0   : > { %v309_v6 = vsel %vm301_vm0, %v308_v5, 0.0 }
  0xf1   : > { %310 = vadd.xlane.f32.xlu0 %v309_v6 }
 0x17e   : > { %v311_v15 = vpop.xlane.xlu0 %310 }
 0x17f   : > { %v312_v16 = vmul.f32 0.03125, %v311_v15 }
 0x181   : > { %v313_v17 = vadd.f32 1e-06, %v312_v16 }
 0x183   : > { %659 = vrsqrt.f32 %v313_v17 }
 0x18d   : > { %v660_v18 = vpop.eup %659 }
 0x18e   : > { %v315_v20 = vmul.f32 %v660_v18, %v307_v4 }
 0x190   : > { %v323_v22 = vmul.f32 %v551_v19, %v315_v20 }
 0x192   : > { %v331_v23 = vadd.f32 %v552_v21, %v323_v22 }
 0x194   : > { %573 = vmatmul.mubr.msk.f32.vlgmr.msra.gmra.mrb[0].mxu0 %vm301_vm0, %v331_v23 }
 0x267   : > { %v412_v25 = vpop.f32.mrb[0].mxu0 }
 0x268   : > { %v413_v26 = vadd.f32 %v553_v24, %v412_v25  ;;  %v574_v27 = vpop.f32.mrb[1].mxu0 }
 0x26a   : > { %416 = vst [vmem:[%s293_s16] sm:$0xff] %v413_v26 }
 0x26b   : > { %732 = shalt.err (!%p729_p9)
}
 0x26c   : > { %s733_s8 = scalar_lea.hbm %s1028_s28, 128  ;;  %s737_s7 = scalar_lea.hbm %s1082_s5, 256 }
 0x26d   : > { %p734_p1 = scmp.ne.s32.totalorder %s1028_s28, %s733_s8  ;;  %p738_p3 = scmp.lt.u32.totalorder %s1028_s28, %s1082_s5 }
 0x26e   : > { %p739_p13 = scmp.lt.u32.totalorder %s737_s7, %s733_s8  ;;  %p741_p6 = scmp.lt.u32.totalorder %s733_s8, %s1028_s28 }
 0x26f   : > { %p735_p2 = pnand %p734_p1, %p941_p10 }
 0x270   : > { %p740_p4 = por %p739_p13, %p738_p3 }
 0x271   : > { %p736_p7 = pneg %p735_p2 }
 0x272   : > { %p742_p8 = por %p741_p6, %p740_p4 }
 0x274   : > { %p743_p12 = pnand %p742_p8, %p736_p7 }
 0x276   : > { %746 = shalt.err (!%p743_p12)
}
 0x277   : > { %587 = dma.vmem_to_hbm [thread:$0]  (%p941_p10), %s1030_s12, 128, %s1028_s28, %s418_s30  }
 0x278 PF: > { %s444_s16 = sand.u32 1, %s785_s18   ;;  %p1100_p11 = scmp.ne.s32.totalorder %s1090_s29, 0 }
 0x279   : > { %p1101_p0 = scmp.ge.s32.totalorder %s805_s23, 2  ;;  %s445_s24 = scalar_lea.sflag [#allocation4], %s444_s16 }
 0x27b   : > { %p598_p5 = pnand %p1101_p0, %p1100_p11 }
 0x27d   : > { %780 = dma.done.wait (!%p598_p5), %s445_s24, 128  }
 0x27e   : > { %782 = vsyncadd (!%p598_p5), %s445_s24, 4294967168  ;;  %s22_s23 = sadd.s32 1, %s805_s23   ;;  %s1102_s18 = smov %s789_s19 }
 0x27f   : > { %p19_p9 = scmp.ge.s32.totalorder %s22_s23, 4   ;;  %s1103_s19 = smov %s793_s20 }
 0x280   : > { %s1104_s20 = smov %s950_s15  ;;  %s1105_s21 = smov %s801_s22 }
 0x281   : > { %s1106_s22 = smov %s1108_s9  ;;  %21 = sbr.rel (!%p19_p9) target bundleno = 7 (0x7), region = 95 }
 0x288   :  { %450 = vsyncpa [#allocation3], 1 }
 0x289   :  { %452 = vsyncpa [#allocation3 + $0x1], 1 }
 0x28a   :  { %453 = vsyncpa [#allocation6], 1 }
 0x28b   :  { %454 = vsyncpa [#allocation4], 1 }
 0x28c   :  { %456 = vsyncpa [#allocation4 + $0x1], 1 }

</bundles_post_ra>
